<compile_context>
chip_gen: v7x
topology: tpu7x:2x2x1
jax: 0.10.0
libtpu: 0.0.40
codegen_flags: <defaults>
</compile_context>

<pallas_src>
import functools

import jax
import jax.numpy as jnp
from jax.experimental import pallas as pl
from jax.experimental.pallas import tpu as pltpu


def _cores_kernel(x_ref, t_ref, w_ref, o_ref):
    # x_ref : VMEM (TN, C)  logits tile (f32 or bf16)
    # t_ref : VMEM (TN, 1)  int32 targets
    # w_ref : VMEM (1,  C)  f32 alpha-scaled class prior (alpha/C when prior is None)
    # o_ref : VMEM (1, TN)  f32 per-sample loss (lane-dense)
    x = x_ref[...].astype(jnp.float32)                  # (TN, C)
    t = t_ref[...]                                      # (TN, 1) int32
    w = w_ref[...]                                      # (1, C)  f32

    # numerically-stable logsumexp pieces over the class (lane) axis (XLU reduces)
    m = jnp.max(x, axis=1, keepdims=True)               # (TN, 1)
    ex = jnp.exp(x - m)                                 # (TN, C)   EUP
    se = jnp.sum(ex, axis=1, keepdims=True)             # (TN, 1)
    log_se = jnp.log(se)                                # (TN, 1)   EUP
    lse = m + log_se                                    # logsumexp per row

    # -log(softmax(x) + 1e-8) == log(se) - log(ex + 1e-8*se)   (eps-exact, no divide)
    loss_ = log_se - jnp.log(ex + 1e-8 * se)            # (TN, C)   EUP

    # One-hot CE contribution folded into a single select (no convert, no extra mul).
    cls = jax.lax.broadcasted_iota(jnp.int32, x.shape, 1)
    contrib = jnp.where(cls == t, lse - x, 0.0) - w * loss_      # (TN, C)

    # Row-sum of `contrib` over classes equals  ce_i - alpha * peer_i .
    # Standard (TN,C)x(C,8) MXU orientation: the big tile is the LHS (no transpose
    # of contrib needed); only the tiny (TN,8) result crosses the XLU to become the
    # lane-dense (1,TN) output block (dense, unmasked lane stores).
    ones_rhs = jnp.ones((x.shape[1], 8), jnp.float32)
    red = jax.lax.dot_general(
        contrib, ones_rhs,
        dimension_numbers=(((1,), (0,)), ((), ())),
        preferred_element_type=jnp.float32,
        precision=jax.lax.Precision.HIGHEST)            # (TN, 8), columns identical
    o_ref[...] = jnp.transpose(red)[0:1, :]             # tiny (TN,8)->(8,TN) transpose


def _round_down_128(v):
    return max(128, (v // 128) * 128)


def _vmem_bytes(tile, c, in_itemsize):
    """Rough per-kernel VMEM footprint estimate for a given batch tile."""
    lanes_c = max(c, 128)
    return (2 * tile * lanes_c * in_itemsize      # double-buffered logits tile
            + 2 * tile * 128 * 4                  # double-buffered (TN,1) targets (lane-padded)
            + 6 * tile * lanes_c * 4              # in-flight f32 temporaries
            + 2 * 8 * max(tile, 128) * 4          # double-buffered (1,TN) output (sublane-padded)
            + (2 << 20))                          # constants / headroom


def _pick_tile(n, c, in_itemsize, requested, budget):
    """Pick a batch tile.

    Large enough to amortize the ~0.35 us/grid-step pipeline overhead (target ~1M
    logits elements per tile for narrow C), small enough to fit the VMEM budget,
    and capped so big batches get >= 4 grid steps (v7x has 2 TensorCores that the
    'parallel' batch axis can shard across).
    """
    if requested is None:
        requested = max(512, min(4096, _round_down_128((1 << 20) // max(c, 1))))
    if n >= 1024:
        requested = min(requested, _round_down_128(pl.cdiv(n, 4)))
    tile = n if n <= requested else _round_down_128(min(requested, n))
    while tile > 128 and _vmem_bytes(tile, c, in_itemsize) > budget:
        tile = _round_down_128(tile // 2)
    if _vmem_bytes(tile, c, in_itemsize) > budget:
        # TODO(synk): add a class-dimension grid axis (online logsumexp + running
        # weighted peer sum) so vocab-scale C fits VMEM; until then fail loudly.
        raise ValueError(
            f"Cores Pallas kernel: num_classes={c} does not fit the VMEM budget "
            f"({budget} bytes) even at a 128-row batch tile; a class-tiled variant "
            "is required.")
    return tile


@functools.lru_cache(maxsize=1)
def _vmem_ceiling_bytes():
    """~75% of the physical per-TensorCore VMEM (64 MiB on v7x, 128 MiB on v5e/v6e)."""
    try:
        cap = int(pltpu.get_tpu_info().vmem_capacity_bytes)
    except Exception:                                    # query unavailable -> be conservative (v7x)
        cap = 64 * 2**20
    return (cap * 3) // 4


@functools.partial(jax.jit, static_argnames=("tile", "vmem_limit"))
def _cores_call(inputs, targets2d, class_weights, *, tile, vmem_limit):
    n, c = inputs.shape
    return pl.pallas_call(
        _cores_kernel,
        out_shape=jax.ShapeDtypeStruct((1, n), jnp.float32),
        grid=(pl.cdiv(n, tile),),
        in_specs=[
            pl.BlockSpec((tile, c), lambda i: (i, 0)),      # logits tile
            pl.BlockSpec((tile, 1), lambda i: (i, 0)),      # targets tile
            pl.BlockSpec((1, c), lambda i: (0, 0)),         # alpha-scaled prior (resident)
        ],
        out_specs=pl.BlockSpec((1, tile), lambda i: (0, i)),  # lane-dense losses
        compiler_params=pltpu.CompilerParams(
            dimension_semantics=("parallel",),              # batch axis shards across TCs
            vmem_limit_bytes=vmem_limit),
    )(inputs, targets2d, class_weights)


def cores_loss(inputs, targets, alpha=1.0, noisy_prior=None,
               tile_n=None, vmem_budget_bytes=24 * 2**20):
    """JAX/Pallas equivalent of Cores.forward(epoch, inputs, targets).

    `alpha` is the already-selected alpha_plan[epoch] (host-side scalar lookup).
    `inputs` may be float32 or bfloat16 (bf16 recommended on v5e to halve HBM
    traffic); compute is done in float32 in VMEM.
    """
    n, c = inputs.shape
    if noisy_prior is None:
        prior = jnp.full((1, c), 1.0 / c, dtype=jnp.float32)   # torch.mean == sum((1/C)*.)
    else:
        prior = jnp.asarray(noisy_prior, dtype=jnp.float32).reshape(1, c)
    class_weights = jnp.asarray(alpha, jnp.float32) * prior    # fold alpha into the prior
    targets2d = targets.astype(jnp.int32).reshape(n, 1)

    in_itemsize = jnp.dtype(inputs.dtype).itemsize
    ceiling = _vmem_ceiling_bytes()
    budget = min(int(vmem_budget_bytes), ceiling // 2)         # leave room for 2x in the limit
    tile = _pick_tile(n, c, in_itemsize, tile_n, budget)
    vmem_limit = int(min(ceiling,
                         max(2 * _vmem_bytes(tile, c, in_itemsize), 32 * 2**20)))
    out = _cores_call(inputs, targets2d, class_weights,
                      tile=tile, vmem_limit=vmem_limit)
    return out.reshape(n)


def _cores_ref(inputs, targets, alpha=1.0, noisy_prior=None):
    """Pure-JAX reference (mirrors the PyTorch formulas) for correctness checking."""
    x = inputs.astype(jnp.float32)
    lse = jax.nn.logsumexp(x, axis=1)
    ce = lse - jnp.take_along_axis(x, targets[:, None].astype(jnp.int32), axis=1)[:, 0]
    loss_ = -jnp.log(jax.nn.softmax(x, axis=1) + 1e-8)
    if noisy_prior is None:
        peer = jnp.mean(loss_, axis=1)
    else:
        peer = jnp.sum(jnp.asarray(noisy_prior, jnp.float32)[None, :] * loss_, axis=1)
    return ce - alpha * peer


if __name__ == "__main__":
    key = jax.random.PRNGKey(0)
    k1, k2, k3, k4, k5 = jax.random.split(key, 5)

    N, C = 16, 32

    # Case 1: f32 logits, noisy_prior=None (mean over classes), alpha = 1.0
    inputs = jax.random.normal(k1, (N, C), dtype=jnp.float32)
    targets = jax.random.randint(k2, (N,), 0, C, dtype=jnp.int32)
    out = jax.block_until_ready(cores_loss(inputs, targets, alpha=1.0, noisy_prior=None))
    ref = _cores_ref(inputs, targets, alpha=1.0, noisy_prior=None)
    assert out.shape == (N,)
    assert jnp.allclose(out, ref, atol=1e-4, rtol=1e-4), (out, ref)

    # Case 2: noisy_prior vector, alpha picked from an "alpha_plan"
    prior = jax.nn.softmax(jax.random.normal(k3, (C,), dtype=jnp.float32))
    alpha_plan = [0.0, 0.5, 1.0]
    epoch = 1
    out2 = jax.block_until_ready(
        cores_loss(inputs, targets, alpha=alpha_plan[epoch], noisy_prior=prior))
    ref2 = _cores_ref(inputs, targets, alpha=alpha_plan[epoch], noisy_prior=prior)
    assert jnp.allclose(out2, ref2, atol=1e-4, rtol=1e-4), (out2, ref2)

    # Case 3: bf16 logits, batch not a multiple of the tile -> exercises the
    # cdiv grid with a clipped final block and a multi-step grid.
    N3 = 200
    inputs3 = jax.random.normal(k4, (N3, C), dtype=jnp.bfloat16)
    targets3 = jax.random.randint(k5, (N3,), 0, C, dtype=jnp.int32)
    out3 = jax.block_until_ready(
        cores_loss(inputs3, targets3, alpha=1.0, noisy_prior=prior, tile_n=128))
    ref3 = _cores_ref(inputs3, targets3, alpha=1.0, noisy_prior=prior)
    assert out3.shape == (N3,)
    assert jnp.allclose(out3, ref3, atol=1e-4, rtol=1e-4), (out3, ref3)

    print("KERNEL_OK")
</pallas_src>

<mosaic_0001>
module attributes {stable_mosaic.version = 11 : i64} {
  func.func @_cores_kernel(%arg0: i32, %arg1: memref<16x32xf32, #tpu.memory_space<vmem>>, %arg2: memref<16x1xi32, #tpu.memory_space<vmem>>, %arg3: memref<1x32xf32, #tpu.memory_space<vmem>>, %arg4: memref<1x16xf32, #tpu.memory_space<vmem>>) attributes {dimension_semantics = [#tpu.dimension_semantics<parallel>], iteration_bounds = array<i64: 1>, scalar_prefetch = 0 : i64, scratch_operands = 0 : i64, tpu.core_type = #tpu.core_type<tc>, window_params = [{transform_indices = @transform_0, window_bounds = array<i64: 16, 32>}, {transform_indices = @transform_1, window_bounds = array<i64: 16, 1>}, {pipeline_mode = #tpu.pipeline_mode<synchronous>, transform_indices = @transform_2, window_bounds = array<i64: 1, 32>}, {transform_indices = @transform_3, window_bounds = array<i64: 1, 16>}]} {
    %c0 = arith.constant 0 : index
    %c0_0 = arith.constant 0 : index
    %0 = vector.load %arg1[%c0, %c0_0] : memref<16x32xf32, #tpu.memory_space<vmem>>, vector<16x32xf32>
    %c0_1 = arith.constant 0 : index
    %c0_2 = arith.constant 0 : index
    %1 = vector.load %arg2[%c0_1, %c0_2] : memref<16x1xi32, #tpu.memory_space<vmem>>, vector<16x1xi32>
    %c0_3 = arith.constant 0 : index
    %c0_4 = arith.constant 0 : index
    %2 = vector.load %arg3[%c0_3, %c0_4] : memref<1x32xf32, #tpu.memory_space<vmem>>, vector<1x32xf32>
    %cst = arith.constant dense<0xFF800000> : vector<16xf32>
    %3 = vector.multi_reduction <maximumf>, %0, %cst [1] : vector<16x32xf32> to vector<16xf32>
    %4 = vector.shape_cast %3 : vector<16xf32> to vector<16x1xf32>
    %5 = vector.broadcast %4 : vector<16x1xf32> to vector<16x32xf32>
    %6 = arith.subf %0, %5 : vector<16x32xf32>
    %7 = math.exp %6 : vector<16x32xf32>
    %cst_5 = arith.constant dense<0.000000e+00> : vector<16xf32>
    %8 = vector.multi_reduction <add>, %7, %cst_5 [1] : vector<16x32xf32> to vector<16xf32>
    %9 = vector.shape_cast %8 : vector<16xf32> to vector<16x1xf32>
    %10 = math.log %9 : vector<16x1xf32>
    %11 = arith.addf %4, %10 : vector<16x1xf32>
    %cst_6 = arith.constant 9.99999993E-9 : f32
    %12 = vector.broadcast %cst_6 : f32 to vector<16x1xf32>
    %13 = arith.mulf %12, %9 : vector<16x1xf32>
    %14 = vector.broadcast %13 : vector<16x1xf32> to vector<16x32xf32>
    %15 = arith.addf %7, %14 : vector<16x32xf32>
    %16 = math.log %15 : vector<16x32xf32>
    %17 = vector.broadcast %10 : vector<16x1xf32> to vector<16x32xf32>
    %18 = arith.subf %17, %16 : vector<16x32xf32>
    %19 = tpu.iota {dimensions = array<i32: 1>} : vector<16x32xi32>
    %20 = vector.broadcast %1 : vector<16x1xi32> to vector<16x32xi32>
    %21 = arith.cmpi eq, %19, %20 : vector<16x32xi32>
    %22 = vector.broadcast %11 : vector<16x1xf32> to vector<16x32xf32>
    %23 = arith.subf %22, %0 : vector<16x32xf32>
    %cst_7 = arith.constant 0.000000e+00 : f32
    %24 = vector.broadcast %cst_7 : f32 to vector<16x32xf32>
    %25 = arith.select %21, %23, %24 : vector<16x32xi1>, vector<16x32xf32>
    %26 = vector.broadcast %2 : vector<1x32xf32> to vector<16x32xf32>
    %27 = arith.mulf %26, %18 : vector<16x32xf32>
    %28 = arith.subf %25, %27 : vector<16x32xf32>
    %cst_8 = arith.constant 1.000000e+00 : f32
    %29 = vector.broadcast %cst_8 : f32 to vector<32x8xf32>
    %cst_9 = arith.constant dense<0.000000e+00> : vector<16x8xf32>
    %30 = tpu.matmul %28, %29, %cst_9 {dimension_numbers = #tpu.dot_dimension_numbers<[1], [0], [0], [1], [0, 0, 1, 1], [], []>, precision = #tpu.contract_precision<fp32>} : vector<16x32xf32>, vector<32x8xf32>, vector<16x8xf32> -> vector<16x8xf32>
    %31 = tpu.transpose %30, [1, 0] : vector<16x8xf32> -> vector<8x16xf32>
    %32 = vector.extract_strided_slice %31 {offsets = [0, 0], sizes = [1, 16], strides = [1, 1]} : vector<8x16xf32> to vector<1x16xf32>
    %c0_10 = arith.constant 0 : index
    %c0_11 = arith.constant 0 : index
    %33 = vector.load %arg4[%c0_10, %c0_11] : memref<1x16xf32, #tpu.memory_space<vmem>>, vector<1x16xf32>
    tpu.vector_store %arg4[%c0_10, %c0_11], %32 {strides = array<i32>} : memref<1x16xf32, #tpu.memory_space<vmem>>, vector<1x16xf32>,
    return
  }
  func.func @transform_0(%arg0: i32) -> (i32, i32) {
    %c0_i32 = arith.constant 0 : i32
    %c0_i32_0 = arith.constant 0 : i32
    return %arg0, %c0_i32 : i32, i32
  }
  func.func @transform_1(%arg0: i32) -> (i32, i32) {
    %c0_i32 = arith.constant 0 : i32
    %c0_i32_0 = arith.constant 0 : i32
    return %arg0, %c0_i32 : i32, i32
  }
  func.func @transform_2(%arg0: i32) -> (i32, i32) {
    %c0_i32 = arith.constant 0 : i32
    %c0_i32_0 = arith.constant 0 : i32
    %c0_i32_1 = arith.constant 0 : i32
    return %c0_i32, %c0_i32_0 : i32, i32
  }
  func.func @transform_3(%arg0: i32) -> (i32, i32) {
    %c0_i32 = arith.constant 0 : i32
    %c0_i32_0 = arith.constant 0 : i32
    return %c0_i32, %arg0 : i32, i32
  }
}

</mosaic_0001>

<bundles_post_ra>
// kernel: _cores_call.1
= control target key start
LH: loop header
LB: loop body
LE: loop exit
PB: predicated region body
PF: predicated region fallthrough
CT: control target
= control target key end

     0   :  { %vm20_vm0 = vcmask 261120   ;;  %s834_s0 = inlined_call_operand.vmem [shape: f32[16,32], index: 0, kind: input, shape index: {}]   ;;  %s835_s1 = inlined_call_operand.vmem [shape: s32[16,1], index: 1, kind: input, shape index: {}]   ;;  %s836_s2 = inlined_call_operand.vmem [shape: f32[1,32], index: 2, kind: input, shape index: {}]   ;;  %s837_s3 = inlined_call_operand.hbm [shape: f32[1,16], index: 3, kind: output, shape index: {}]  }
   0x1   :  { %v776_v0 = vld [vmem:[%s834_s0] sm:$0xff]  ;;  %v781_v1 = vld [vmem:[%s834_s0 + $0x8] sm:$0xff] }
   0x2   :  { %8 = vsyncpa [#allocation3], 0  ;;  %v21_v2 = vsel %vm20_vm0, %v776_v0, -inf  ;;  %v24_v3 = vsel %vm20_vm0, %v781_v1, -inf  ;;  %v17_v4 = vld [vmem:[%s835_s1] sm:$0xff]  ;;  %v749_v5 = vmov 0   ;;  %v55_v25 = vlaneseq }
   0x3   :  { %22 = vmax.xlane.f32.xlu0 %v21_v2  ;;  %712 = vset.pattern.permute.xlu1 %v749_v5  ;;  %v18_v16 = vld [vmem:[%s835_s1 + $0x8] sm:$0xff]  ;;  %v750_v17 = vmov 0.0   ;;  %v751_v18 = vmov 1.0|1.0   ;;  %v609_v35 = vld [vmem:[%s836_s2] ss:$0 sm:$0xff] }
   0x4   :  { %711 = vset.pattern.permute.xlu0 %v749_v5  ;;  %648 = vmatprep.subr.mxu0 %v750_v17  ;;  %v56_v29 = vand.u32 127, %v55_v25  ;;  %s752_s2 = smov [#allocation2]   ;;  %vm593_vm3 = vcmask 122880  }
   0x5   :  { %649 = vmatpush3.msra.mxu0 %v750_v17  ;;  %685 = vmatprep.subr.bf16.mxu1 %v751_v18  ;;  %s601_s20 = sshll.u32 %s752_s2, 4  ;;  %s602_s20 = int_to_ptr.vmem [resolvable:$true] %s601_s20 }
   0x6   :  { %653 = vmatprep.subr.mxu0 %v750_v17  ;;  %686 = vmatpush3.bf16.msra.mxu1 %v751_v18  ;;  %s725_s21 = scalar_lea.vmem %s602_s20, 16  ;;  %s729_s22 = scalar_lea.vmem %s602_s20, 32 }
   0x7   :  { %25 = vmax.xlane.f32.xlu0 %v24_v3  ;;  %687 = vmatprep.subr.bf16.mxu1 %v751_v18  ;;  %p726_p0 = scmp.ne.s32.totalorder %s602_s20, %s725_s21  ;;  %p730_p1 = scmp.lt.s32.totalorder %s602_s20, %s602_s20 }
   0x8   :  { %p731_p2 = scmp.lt.s32.totalorder %s729_s22, %s725_s21 }
   0xa   :  { %688 = vmatpush3.bf16.msra.mxu1 %v751_v18  ;;  %p732_p3 = por %p731_p2, %p730_p1 }
   0xb   :  { %689 = vmatprep.subr.bf16.mxu1 %v751_v18 }
   0xc   :  { %p733_p4 = pnand %p732_p3, %p726_p0 }
  0x1d   :  { %58 = vperm.xlu0 %711, %v17_v4  }
  0x90   :  { %v23_v6 = vpop.xlane.xlu0 %22 }
  0x91   :  { %v27_v7 = vsub.f32 %v776_v0, %v23_v6 }
  0x93   :  { %v29_v8 = vmul.f32 1.442695, %v27_v7 }
  0x94   :  { %v26_v9 = vpop.xlane.xlu0 %25 }
  0x95   :  { %713 = vpow2.f32 %v29_v8  ;;  %v28_v10 = vsub.f32 %v781_v1, %v26_v9 }
  0x97   :  { %v31_v11 = vmul.f32 1.442695, %v28_v10 }
  0x99   :  { %715 = vpow2.f32 %v31_v11 }
  0x9c   :  { %v59_v31 = vpop.permute.xlu0 %58 }
  0x9d   :  { %vm63_vm1 = vcmp.eq.s32.totalorder %v56_v29, %v59_v31 }
  0x9f   :  { %v714_v12 = vpop.eup %713 }
  0xa0   :  { %v33_v13 = vsel %vm20_vm0, %v714_v12, 0.0 }
  0xa1   :  { %34 = vadd.xlane.f32.xlu1 %v33_v13 }
  0xa3   :  { %v716_v14 = vpop.eup %715 }
  0xa4   :  { %v36_v15 = vsel %vm20_vm0, %v716_v14, 0.0 }
  0xa5   :  { %37 = vadd.xlane.f32.xlu1 %v36_v15 }
  0xb6   :  { %61 = vperm.xlu1 %712, %v18_v16  }
 0x12e   :  { %v35_v19 = vpop.xlane.xlu1 %34 }
 0x12f   :  { %717 = vlog2.f32 %v35_v19  ;;  %v45_v20 = vmul.f32 1e-08, %v35_v19 }
 0x131   :  { %v47_v21 = vadd.f32 %v714_v12, %v45_v20 }
 0x132   :  { %v38_v22 = vpop.xlane.xlu1 %37 }
 0x133   :  { %719 = vlog2.f32 %v47_v21  ;;  %v46_v23 = vmul.f32 1e-08, %v38_v22 }
 0x134   :  { %721 = vlog2.f32 %v38_v22 }
 0x135   :  { %v48_v24 = vadd.f32 %v716_v14, %v46_v23 }
 0x136   :  { %v62_v40 = vpop.permute.xlu1 %61 }
 0x137   :  { %723 = vlog2.f32 %v48_v24  ;;  %vm64_vm2 = vcmp.eq.s32.totalorder %v56_v29, %v62_v40 }
 0x139   :  { %v718_v26 = vpop.eup %717 }
 0x13a   :  { %v40_v27 = vmul.f32 0.6931472, %v718_v26 }
 0x13c   :  { %v43_v28 = vadd.f32 %v40_v27, %v23_v6 }
 0x13d   :  { %v720_v30 = vpop.eup %719 }
 0x13e   :  { %v722_v32 = vpop.eup %721  ;;  %v50_v33 = vmul.f32 0.6931472, %v720_v30  ;;  %v65_v36 = vsub.f32 %v43_v28, %v776_v0 }
 0x13f   :  { %v42_v34 = vmul.f32 0.6931472, %v722_v32 }
 0x140   :  { %v53_v37 = vsub.f32 %v40_v27, %v50_v33  ;;  %v67_v43 = vsel %vm63_vm1, %v65_v36, 0.0 }
 0x141   :  { %v724_v38 = vpop.eup %723  ;;  %v44_v39 = vadd.f32 %v42_v34, %v26_v9 }
 0x142   :  { %v52_v41 = vmul.f32 0.6931472, %v724_v38  ;;  %v75_v42 = vmul.f32 %v609_v35, %v53_v37 }
 0x143   :  { %v66_v44 = vsub.f32 %v44_v39, %v781_v1 }
 0x144   :  { %v77_v45 = vsub.f32 %v67_v43, %v75_v42  ;;  %v54_v46 = vsub.f32 %v42_v34, %v52_v41 }
 0x145   :  { %v68_v50 = vsel %vm64_vm2, %v66_v44, 0.0 }
 0x146   :  { %v80_v47 = vsel %vm20_vm0, %v77_v45, 0  ;;  %v76_v48 = vmul.f32 %v609_v35, %v54_v46 }
 0x147   :  { %v150_v49 = vand.u32 4294901760, %v80_v47 }
 0x148   :  { %v78_v51 = vsub.f32 %v68_v50, %v76_v48 }
 0x149   :  { %650 = vmatprep.mubr.f32.mxu0 %v150_v49  ;;  %v151_v52 = vsub.f32 %v80_v47, %v150_v49 }
 0x14a   :  { %v83_v53 = vsel %vm20_vm0, %v78_v51, 0 }
 0x14b   :  { %v160_v54 = vand.u32 4294901760, %v83_v53  ;;  %v152_v55 = vand.u32 4294901760, %v151_v52 }
 0x14d   :  { %v161_v56 = vsub.f32 %v83_v53, %v160_v54  ;;  %651 = vmatmul.mubr.f32.vlgmr.msra.gmra.mrb[0].mxu0 %v160_v54  ;;  %v153_v57 = vsub.f32 %v151_v52, %v152_v55 }
 0x14e   :  { %654 = vmatpush3.msra.mxu0 %v750_v17  ;;  %655 = vmatprep.mubr.f32.mxu0 %v151_v52 }
 0x14f   :  { %v154_v58 = vand.u32 4294901760, %v153_v57  ;;  %669 = vmatprep.subr.mxu0 %v750_v17  ;;  %v162_v59 = vand.u32 4294901760, %v161_v56 }
 0x151   :  { %645 = vmatprep.mubr.f32.mxu1 %v154_v58  ;;  %v163_v60 = vsub.f32 %v161_v56, %v162_v59 }
 0x153   :  { %v164_v61 = vand.u32 4294901760, %v163_v60 }
 0x155   :  { %646 = vmatmul.mubr.f32.vlgmr.msra.gmra.mrb[0].mxu1 %v164_v61  ;;  %656 = vmatmul.mubr.f32.vlgmr.msra.gmra.mrb[0].mxu0 %v161_v56 }
 0x156   :  { %690 = vmatpush3.bf16.msra.mxu1 %v751_v18  ;;  %670 = vmatpush3.msra.mxu0 %v750_v17 }
 0x157   :  { %666 = vmatprep.mubr.f32.mxu1 %v152_v55  ;;  %671 = vmatprep.mubr.f32.mxu0 %v150_v49 }
 0x158   :  { %691 = vmatprep.subr.bf16.mxu1 %v751_v18  ;;  %693 = vmatprep.subr.bf16.mxu0 %v751_v18 }
 0x159   :  { %672 = vmatmul.mubr.f32.vlgmr.msra.gmra.mrb[2].mxu0 %v160_v54 }
 0x15a   :  { %692 = vmatpush3.bf16.msra.mxu1 %v751_v18  ;;  %694 = vmatpush3.bf16.msra.mxu0 %v751_v18 }
 0x15b   :  { %682 = vmatprep.mubr.f32.mxu0 %v150_v49  ;;  %695 = vmatprep.subr.bf16.mxu0 %v751_v18 }
 0x15d   :  { %667 = vmatmul.mubr.f32.vlgmr.msra.gmra.mrb[2].mxu1 %v162_v59 }
 0x15e   :  { %696 = vmatpush3.bf16.msra.mxu0 %v751_v18 }
 0x161   :  { %683 = vmatmul.mubr.f32.vlgmr.msra.gmra.mrb[2].mxu0 %v160_v54 }
 0x228   :  { %v647_v62 = vpop.f32.mrb[0].mxu1  ;;  %v657_v63 = vpop.f32.mrb[0].mxu0 }
 0x229   :  { %v697_v0 = vadd.f32 %v657_v63, %v647_v62  ;;  %v156_v1 = vpop.f32.mrb[1].mxu1  ;;  %v315_v2 = vpop.f32.mrb[1].mxu0 }
 0x22a   :  { %v700_v3 = vadd.f32 %v315_v2, %v156_v1 }
 0x230   :  { %v668_v4 = vpop.f32.mrb[2].mxu1 }
 0x231   :  { %v698_v5 = vadd.f32 %v697_v0, %v668_v4  ;;  %v395_v6 = vpop.f32.mrb[3].mxu1 }
 0x232   :  { %v701_v7 = vadd.f32 %v700_v3, %v395_v6 }
 0x234   :  { %v684_v8 = vpop.f32.mrb[2].mxu0 }
 0x235   :  { %v699_v9 = vadd.f32 %v698_v5, %v684_v8  ;;  %v551_v10 = vpop.f32.mrb[3].mxu0 }
 0x236   :  { %v702_v11 = vadd.f32 %v701_v7, %v551_v10 }
 0x238   :  { %561 = vxpose.xlu1.b32.start [1/2] (short) (narrow) %v702_v11, 8 }
 0x23c   :  { %562 = vxpose.xlu1.b32.end [2/2] (short) (narrow) %v699_v9, 8 }
 0x2b8   :  { %v577_v12 = vpop.trf.xlu1 }
 0x2b9   :  { %594 = vst.msk [vmem:[#allocation2] sm:$0x1] %vm593_vm3, %v577_v12 }
 0x2ba   :  { %736 = shalt.err (!%p733_p4)
}
 0x2bb   :  { %s737_s25 = scalar_lea.hbm %s837_s3, 16 }
 0x2bc   :  { %p738_p5 = scmp.ne.s32.totalorder %s837_s3, %s737_s25  ;;  %p741_p6 = scmp.lt.u32.totalorder %s737_s25, %s837_s3 }
 0x2be   :  { %p743_p7 = pnand %p741_p6, %p738_p5 }
 0x2c0   :  { %746 = shalt.err (!%p743_p7)
}
 0x2c1   :  { %604 = dma.vmem_to_hbm [thread:$0]  %s602_s20, 16, %s837_s3, [#allocation3]  }
 0x2c2   :  { %747 = dma.done.wait [#allocation3], 16  }
 0x2c3   :  { %748 = vsyncadd [#allocation3], 4294967280 }
 0x2c4   :  { %608 = vsyncpa [#allocation3], 1 }

</bundles_post_ra>
